<compile_context>
chip_gen: v7x
topology: tpu7x:2x2x1
jax: 0.10.0
libtpu: 0.0.40
codegen_flags: <defaults>
</compile_context>

<pallas_src>
import math

import jax
import jax.numpy as jnp
from jax.experimental import pallas as pl
from jax.experimental.pallas import tpu as pltpu

# ---- model hyper-parameters (small, consistent with the module) -------------
B = 2          # batch
S = 8          # sequence length
E = 32         # embedding_dim
H = 4          # num_heads
D = E // H     # head dim
F = 64         # ff_dim
EPS = 1e-5     # nn.LayerNorm default eps
NEG_INF = -1e30
BS = B * S


def _layernorm(v, gamma, beta):
    # v: (BS, E), gamma/beta: (1, E)
    mu = jnp.mean(v, axis=-1, keepdims=True)
    var = jnp.mean((v - mu) ** 2, axis=-1, keepdims=True)
    return (v - mu) * jax.lax.rsqrt(var + EPS) * gamma + beta


def decoder_layer_kernel(
    x_ref,                 # (BS, E)
    vecs_ref,              # (6, E): g1, bt1, g2, bt2, bo, b2
    wqkv_ref, bqkv_ref,    # (E, 3E), (1, 3E)
    wo_ref,                # (E, E)
    w1_ref, b1_ref,        # (E, F), (1, F)
    w2_ref,                # (F, E)
    out_ref,               # (BS, E)
    attn_ref,              # (BS, H*S)  lane-packed attention weights
):
    xf = x_ref[...]                                   # (BS, E)
    g1 = vecs_ref[0:1, :]
    bt1 = vecs_ref[1:2, :]
    g2 = vecs_ref[2:3, :]
    bt2 = vecs_ref[3:4, :]
    bo = vecs_ref[4:5, :]
    b2 = vecs_ref[5:6, :]

    # ---- norm1 (all rows at once) ----
    h = _layernorm(xf, g1, bt1)

    # ---- fused QKV projection ----
    qkv = jnp.dot(h, wqkv_ref[...], preferred_element_type=jnp.float32) + bqkv_ref[...]
    q = qkv[:, 0:E]
    k = qkv[:, E:2 * E]
    v = qkv[:, 2 * E:3 * E]

    # ---- block-diagonal causal mask over the flattened (BS, BS) scores ----
    r = jax.lax.broadcasted_iota(jnp.int32, (BS, BS), 0)
    c = jax.lax.broadcasted_iota(jnp.int32, (BS, BS), 1)
    causal = c <= r
    same = (r < S) & (c < S)
    for b in range(1, B):                             # static, B is tiny
        lo, hi = b * S, (b + 1) * S
        same = same | ((r >= lo) & (r < hi) & (c >= lo) & (c < hi))
    mask = causal & same

    scale = 1.0 / math.sqrt(D)
    acc = jnp.zeros((BS, E), jnp.float32)             # output-projection accumulator
    attn_cols = []
    for hd in range(H):                               # static unrolled loop over heads
        lo, hi = hd * D, (hd + 1) * D
        qh = q[:, lo:hi]                              # (BS, D)
        kh = k[:, lo:hi]
        vh = v[:, lo:hi]
        # scores over all rows of all batches at once; cross-batch masked out
        s = jax.lax.dot_general(
            qh, kh, (((1,), (1,)), ((), ())),
            preferred_element_type=jnp.float32) * scale          # (BS, BS)
        s = jnp.where(mask, s, NEG_INF)
        m = jnp.max(s, axis=-1, keepdims=True)
        p = jnp.exp(s - m)                                        # masked entries -> 0
        w = p / jnp.sum(p, axis=-1, keepdims=True)                # (BS, BS)
        # keep only the per-batch diagonal (S, S) blocks, rows stacked -> (BS, S)
        attn_cols.append(jnp.concatenate(
            [w[b * S:(b + 1) * S, b * S:(b + 1) * S] for b in range(B)], axis=0))
        # fold head contribution straight into the output projection (no concat)
        wv = jnp.dot(w, vh, preferred_element_type=jnp.float32)   # (BS, D)
        acc = acc + jnp.dot(wv, wo_ref[lo:hi, :],
                            preferred_element_type=jnp.float32)   # (BS, E)

    # single lane-packed store of the attention weights: (BS, H*S)
    attn_ref[...] = jnp.concatenate(attn_cols, axis=-1)

    # ---- residual 1 ----
    x1 = xf + acc + bo

    # ---- norm2 + MLP ----
    h2 = _layernorm(x1, g2, bt2)
    ff = jnp.dot(h2, w1_ref[...], preferred_element_type=jnp.float32) + b1_ref[...]
    ff = jax.nn.gelu(ff, approximate=True)            # MLP activation (GELU, tanh approx)
    mlp_out = jnp.dot(ff, w2_ref[...], preferred_element_type=jnp.float32) + b2

    # ---- residual 2 ----
    out_ref[...] = x1 + mlp_out


def decoder_layer(x, params):
    (g1, bt1, wq, bq, wk, bk, wv, bv, wo, bo, g2, bt2, w1, b1, w2, b2) = params

    # wrapper-side packing: pure layout plumbing, keeps the kernel DMA count low
    wqkv = jnp.concatenate([wq, wk, wv], axis=1)                 # (E, 3E)
    bqkv = jnp.concatenate([bq, bk, bv], axis=1)                 # (1, 3E)
    vecs = jnp.concatenate([g1, bt1, g2, bt2, bo, b2], axis=0)   # (6, E)
    x2 = x.reshape(BS, E)

    full = lambda shape: pl.BlockSpec(shape, lambda i: (0,) * len(shape))
    in_specs = [
        full((BS, E)),           # x (flattened)
        full((6, E)),            # packed gamma/beta/bias vectors
        full((E, 3 * E)),        # fused Wqkv
        full((1, 3 * E)),        # fused bqkv
        full((E, E)),            # Wo
        full((E, F)),            # W1
        full((1, F)),            # b1
        full((F, E)),            # W2
    ]
    out_specs = [
        full((BS, E)),
        full((BS, H * S)),
    ]
    out_shapes = (
        jax.ShapeDtypeStruct((BS, E), jnp.float32),
        jax.ShapeDtypeStruct((BS, H * S), jnp.float32),
    )
    out2, attn_packed = pl.pallas_call(
        decoder_layer_kernel,
        out_shape=out_shapes,
        grid=(1,),
        in_specs=in_specs,
        out_specs=out_specs,
        compiler_params=pltpu.CompilerParams(dimension_semantics=("arbitrary",)),
    )(x2, vecs, wqkv, bqkv, wo, w1, b1, w2)

    out = out2.reshape(B, S, E)
    # unpack lane-dense (BS, H*S) attention weights back to (B, H, S, S)
    attn = attn_packed.reshape(B, S, H, S).transpose(0, 2, 1, 3)
    return out, attn


# ---- pure-JAX reference for a correctness sanity check ----------------------
def decoder_layer_ref(x, params):
    (g1, bt1, wq, bq, wk, bk, wv, bv, wo, bo, g2, bt2, w1, b1, w2, b2) = params

    def ln(v, g, b):
        mu = jnp.mean(v, axis=-1, keepdims=True)
        var = jnp.mean((v - mu) ** 2, axis=-1, keepdims=True)
        return (v - mu) / jnp.sqrt(var + EPS) * g + b

    h = ln(x, g1, bt1)                                   # (B,S,E)
    q = h @ wq + bq
    k = h @ wk + bk
    v = h @ wv + bv
    qh = q.reshape(B, S, H, D).transpose(0, 2, 1, 3)     # (B,H,S,D)
    kh = k.reshape(B, S, H, D).transpose(0, 2, 1, 3)
    vh = v.reshape(B, S, H, D).transpose(0, 2, 1, 3)
    scores = jnp.einsum("bhqd,bhkd->bhqk", qh, kh) / math.sqrt(D)
    mask = jnp.tril(jnp.ones((S, S), dtype=bool))
    scores = jnp.where(mask, scores, NEG_INF)
    w = jax.nn.softmax(scores, axis=-1)                  # (B,H,S,S)
    ao = jnp.einsum("bhqk,bhkd->bhqd", w, vh).transpose(0, 2, 1, 3).reshape(B, S, E)
    x1 = x + (ao @ wo + bo)
    h2 = ln(x1, g2, bt2)
    ff = jax.nn.gelu(h2 @ w1 + b1, approximate=True)
    out = x1 + (ff @ w2 + b2)
    return out, w


def make_params(key):
    ks = jax.random.split(key, 8)
    scale = 0.02
    g1 = jnp.ones((1, E), jnp.float32)
    bt1 = jnp.zeros((1, E), jnp.float32)
    g2 = jnp.ones((1, E), jnp.float32)
    bt2 = jnp.zeros((1, E), jnp.float32)
    wq = scale * jax.random.normal(ks[0], (E, E), jnp.float32)
    wk = scale * jax.random.normal(ks[1], (E, E), jnp.float32)
    wv = scale * jax.random.normal(ks[2], (E, E), jnp.float32)
    wo = scale * jax.random.normal(ks[3], (E, E), jnp.float32)
    bq = scale * jax.random.normal(ks[4], (1, E), jnp.float32)
    bk = jnp.zeros((1, E), jnp.float32)
    bv = jnp.zeros((1, E), jnp.float32)
    bo = jnp.zeros((1, E), jnp.float32)
    w1 = scale * jax.random.normal(ks[5], (E, F), jnp.float32)
    b1 = scale * jax.random.normal(ks[6], (1, F), jnp.float32)
    w2 = scale * jax.random.normal(ks[7], (F, E), jnp.float32)
    b2 = jnp.zeros((1, E), jnp.float32)
    return (g1, bt1, wq, bq, wk, bk, wv, bv, wo, bo, g2, bt2, w1, b1, w2, b2)


if __name__ == "__main__":
    key = jax.random.PRNGKey(0)
    kx, kp = jax.random.split(key)
    x = jax.random.normal(kx, (B, S, E), jnp.float32)
    params = make_params(kp)

    out, attn = decoder_layer(x, params)
    out = jax.block_until_ready(out)
    attn = jax.block_until_ready(attn)

    out_ref, attn_ref = decoder_layer_ref(x, params)
    assert out.shape == (B, S, E) and attn.shape == (B, H, S, S)
    assert jnp.allclose(out, out_ref, rtol=1e-4, atol=1e-4)
    assert jnp.allclose(attn, attn_ref, rtol=1e-4, atol=1e-4)

    print("KERNEL_OK")
</pallas_src>

<mosaic_0001>
module attributes {stable_mosaic.version = 11 : i64} {
  func.func @decoder_layer_kernel(%arg0: i32, %arg1: memref<16x32xf32, #tpu.memory_space<vmem>>, %arg2: memref<6x32xf32, #tpu.memory_space<vmem>>, %arg3: memref<32x96xf32, #tpu.memory_space<vmem>>, %arg4: memref<1x96xf32, #tpu.memory_space<vmem>>, %arg5: memref<32x32xf32, #tpu.memory_space<vmem>>, %arg6: memref<32x64xf32, #tpu.memory_space<vmem>>, %arg7: memref<1x64xf32, #tpu.memory_space<vmem>>, %arg8: memref<64x32xf32, #tpu.memory_space<vmem>>, %arg9: memref<16x32xf32, #tpu.memory_space<vmem>>, %arg10: memref<16x32xf32, #tpu.memory_space<vmem>>) attributes {dimension_semantics = [#tpu.dimension_semantics<arbitrary>], iteration_bounds = array<i64: 1>, scalar_prefetch = 0 : i64, scratch_operands = 0 : i64, tpu.core_type = #tpu.core_type<tc>, window_params = [{pipeline_mode = #tpu.pipeline_mode<synchronous>, transform_indices = @transform_0, window_bounds = array<i64: 16, 32>}, {pipeline_mode = #tpu.pipeline_mode<synchronous>, transform_indices = @transform_1, window_bounds = array<i64: 6, 32>}, {pipeline_mode = #tpu.pipeline_mode<synchronous>, transform_indices = @transform_2, window_bounds = array<i64: 32, 96>}, {pipeline_mode = #tpu.pipeline_mode<synchronous>, transform_indices = @transform_3, window_bounds = array<i64: 1, 96>}, {pipeline_mode = #tpu.pipeline_mode<synchronous>, transform_indices = @transform_4, window_bounds = array<i64: 32, 32>}, {pipeline_mode = #tpu.pipeline_mode<synchronous>, transform_indices = @transform_5, window_bounds = array<i64: 32, 64>}, {pipeline_mode = #tpu.pipeline_mode<synchronous>, transform_indices = @transform_6, window_bounds = array<i64: 1, 64>}, {pipeline_mode = #tpu.pipeline_mode<synchronous>, transform_indices = @transform_7, window_bounds = array<i64: 64, 32>}, {pipeline_mode = #tpu.pipeline_mode<synchronous>, transform_indices = @transform_8, window_bounds = array<i64: 16, 32>}, {pipeline_mode = #tpu.pipeline_mode<synchronous>, transform_indices = @transform_9, window_bounds = array<i64: 16, 32>}]} {
    %c0 = arith.constant 0 : index
    %c0_0 = arith.constant 0 : index
    %0 = vector.load %arg1[%c0, %c0_0] : memref<16x32xf32, #tpu.memory_space<vmem>>, vector<16x32xf32>
    %c0_1 = arith.constant 0 : index
    %c0_2 = arith.constant 0 : index
    %1 = vector.load %arg2[%c0_1, %c0_2] : memref<6x32xf32, #tpu.memory_space<vmem>>, vector<1x32xf32>
    %c1 = arith.constant 1 : index
    %c0_3 = arith.constant 0 : index
    %2 = vector.load %arg2[%c1, %c0_3] : memref<6x32xf32, #tpu.memory_space<vmem>>, vector<1x32xf32>
    %c2 = arith.constant 2 : index
    %c0_4 = arith.constant 0 : index
    %3 = vector.load %arg2[%c2, %c0_4] : memref<6x32xf32, #tpu.memory_space<vmem>>, vector<1x32xf32>
    %c3 = arith.constant 3 : index
    %c0_5 = arith.constant 0 : index
    %4 = vector.load %arg2[%c3, %c0_5] : memref<6x32xf32, #tpu.memory_space<vmem>>, vector<1x32xf32>
    %c4 = arith.constant 4 : index
    %c0_6 = arith.constant 0 : index
    %5 = vector.load %arg2[%c4, %c0_6] : memref<6x32xf32, #tpu.memory_space<vmem>>, vector<1x32xf32>
    %c5 = arith.constant 5 : index
    %c0_7 = arith.constant 0 : index
    %6 = vector.load %arg2[%c5, %c0_7] : memref<6x32xf32, #tpu.memory_space<vmem>>, vector<1x32xf32>
    %cst = arith.constant dense<0.000000e+00> : vector<16xf32>
    %7 = vector.multi_reduction <add>, %0, %cst [1] : vector<16x32xf32> to vector<16xf32>
    %8 = vector.shape_cast %7 : vector<16xf32> to vector<16x1xf32>
    %cst_8 = arith.constant 3.200000e+01 : f32
    %9 = vector.broadcast %cst_8 : f32 to vector<16x1xf32>
    %10 = arith.divf %8, %9 : vector<16x1xf32>
    %11 = vector.broadcast %10 : vector<16x1xf32> to vector<16x32xf32>
    %12 = arith.subf %0, %11 : vector<16x32xf32>
    %13 = arith.mulf %12, %12 : vector<16x32xf32>
    %cst_9 = arith.constant dense<0.000000e+00> : vector<16xf32>
    %14 = vector.multi_reduction <add>, %13, %cst_9 [1] : vector<16x32xf32> to vector<16xf32>
    %15 = vector.shape_cast %14 : vector<16xf32> to vector<16x1xf32>
    %cst_10 = arith.constant 3.200000e+01 : f32
    %16 = vector.broadcast %cst_10 : f32 to vector<16x1xf32>
    %17 = arith.divf %15, %16 : vector<16x1xf32>
    %18 = vector.broadcast %10 : vector<16x1xf32> to vector<16x32xf32>
    %19 = arith.subf %0, %18 : vector<16x32xf32>
    %cst_11 = arith.constant 9.99999974E-6 : f32
    %20 = vector.broadcast %cst_11 : f32 to vector<16x1xf32>
    %21 = arith.addf %17, %20 : vector<16x1xf32>
    %22 = math.rsqrt %21 : vector<16x1xf32>
    %23 = vector.broadcast %22 : vector<16x1xf32> to vector<16x32xf32>
    %24 = arith.mulf %19, %23 : vector<16x32xf32>
    %25 = vector.broadcast %1 : vector<1x32xf32> to vector<16x32xf32>
    %26 = arith.mulf %24, %25 : vector<16x32xf32>
    %27 = vector.broadcast %2 : vector<1x32xf32> to vector<16x32xf32>
    %28 = arith.addf %26, %27 : vector<16x32xf32>
    %c0_12 = arith.constant 0 : index
    %c0_13 = arith.constant 0 : index
    %29 = vector.load %arg3[%c0_12, %c0_13] : memref<32x96xf32, #tpu.memory_space<vmem>>, vector<32x96xf32>
    %cst_14 = arith.constant dense<0.000000e+00> : vector<16x96xf32>
    %30 = tpu.matmul %28, %29, %cst_14 {dimension_numbers = #tpu.dot_dimension_numbers<[1], [0], [0], [1], [0, 0, 1, 1], [], []>} : vector<16x32xf32>, vector<32x96xf32>, vector<16x96xf32> -> vector<16x96xf32>
    %c0_15 = arith.constant 0 : index
    %c0_16 = arith.constant 0 : index
    %31 = vector.load %arg4[%c0_15, %c0_16] : memref<1x96xf32, #tpu.memory_space<vmem>>, vector<1x96xf32>
    %32 = vector.broadcast %31 : vector<1x96xf32> to vector<16x96xf32>
    %33 = arith.addf %30, %32 : vector<16x96xf32>
    %34 = vector.extract_strided_slice %33 {offsets = [0, 0], sizes = [16, 32], strides = [1, 1]} : vector<16x96xf32> to vector<16x32xf32>
    %35 = vector.extract_strided_slice %33 {offsets = [0, 32], sizes = [16, 32], strides = [1, 1]} : vector<16x96xf32> to vector<16x32xf32>
    %36 = vector.extract_strided_slice %33 {offsets = [0, 64], sizes = [16, 32], strides = [1, 1]} : vector<16x96xf32> to vector<16x32xf32>
    %37 = tpu.iota {dimensions = array<i32: 0>} : vector<16x16xi32>
    %38 = tpu.iota {dimensions = array<i32: 1>} : vector<16x16xi32>
    %39 = arith.cmpi sle, %38, %37 : vector<16x16xi32>
    %c8_i32 = arith.constant 8 : i32
    %40 = vector.broadcast %c8_i32 : i32 to vector<16x16xi32>
    %41 = arith.cmpi slt, %37, %40 : vector<16x16xi32>
    %c8_i32_17 = arith.constant 8 : i32
    %42 = vector.broadcast %c8_i32_17 : i32 to vector<16x16xi32>
    %43 = arith.cmpi slt, %38, %42 : vector<16x16xi32>
    %44 = arith.andi %41, %43 : vector<16x16xi1>
    %c8_i32_18 = arith.constant 8 : i32
    %45 = vector.broadcast %c8_i32_18 : i32 to vector<16x16xi32>
    %46 = arith.cmpi sge, %37, %45 : vector<16x16xi32>
    %c16_i32 = arith.constant 16 : i32
    %47 = vector.broadcast %c16_i32 : i32 to vector<16x16xi32>
    %48 = arith.cmpi slt, %37, %47 : vector<16x16xi32>
    %49 = arith.andi %46, %48 : vector<16x16xi1>
    %c8_i32_19 = arith.constant 8 : i32
    %50 = vector.broadcast %c8_i32_19 : i32 to vector<16x16xi32>
    %51 = arith.cmpi sge, %38, %50 : vector<16x16xi32>
    %52 = arith.andi %49, %51 : vector<16x16xi1>
    %c16_i32_20 = arith.constant 16 : i32
    %53 = vector.broadcast %c16_i32_20 : i32 to vector<16x16xi32>
    %54 = arith.cmpi slt, %38, %53 : vector<16x16xi32>
    %55 = arith.andi %52, %54 : vector<16x16xi1>
    %56 = arith.ori %44, %55 : vector<16x16xi1>
    %57 = arith.andi %39, %56 : vector<16x16xi1>
    %cst_21 = arith.constant 0.000000e+00 : f32
    %58 = vector.broadcast %cst_21 : f32 to vector<16x32xf32>
    %59 = vector.extract_strided_slice %34 {offsets = [0, 0], sizes = [16, 8], strides = [1, 1]} : vector<16x32xf32> to vector<16x8xf32>
    %60 = vector.extract_strided_slice %35 {offsets = [0, 0], sizes = [16, 8], strides = [1, 1]} : vector<16x32xf32> to vector<16x8xf32>
    %61 = vector.extract_strided_slice %36 {offsets = [0, 0], sizes = [16, 8], strides = [1, 1]} : vector<16x32xf32> to vector<16x8xf32>
    %cst_22 = arith.constant dense<0.000000e+00> : vector<16x16xf32>
    %62 = tpu.matmul %59, %60, %cst_22 {dimension_numbers = #tpu.dot_dimension_numbers<[1], [1], [0], [0], [0, 0, 1, 0], [], []>} : vector<16x8xf32>, vector<16x8xf32>, vector<16x16xf32> -> vector<16x16xf32>
    %cst_23 = arith.constant 0.353553385 : f32
    %63 = vector.broadcast %cst_23 : f32 to vector<16x16xf32>
    %64 = arith.mulf %62, %63 : vector<16x16xf32>
    %cst_24 = arith.constant -1.000000e+30 : f32
    %65 = vector.broadcast %cst_24 : f32 to vector<16x16xf32>
    %66 = arith.select %57, %64, %65 : vector<16x16xi1>, vector<16x16xf32>
    %cst_25 = arith.constant dense<0xFF800000> : vector<16xf32>
    %67 = vector.multi_reduction <maximumf>, %66, %cst_25 [1] : vector<16x16xf32> to vector<16xf32>
    %68 = vector.shape_cast %67 : vector<16xf32> to vector<16x1xf32>
    %69 = vector.broadcast %68 : vector<16x1xf32> to vector<16x16xf32>
    %70 = arith.subf %66, %69 : vector<16x16xf32>
    %71 = math.exp %70 : vector<16x16xf32>
    %cst_26 = arith.constant dense<0.000000e+00> : vector<16xf32>
    %72 = vector.multi_reduction <add>, %71, %cst_26 [1] : vector<16x16xf32> to vector<16xf32>
    %73 = vector.shape_cast %72 : vector<16xf32> to vector<16x1xf32>
    %74 = vector.broadcast %73 : vector<16x1xf32> to vector<16x16xf32>
    %75 = arith.divf %71, %74 : vector<16x16xf32>
    %76 = vector.extract_strided_slice %75 {offsets = [0, 0], sizes = [8, 8], strides = [1, 1]} : vector<16x16xf32> to vector<8x8xf32>
    %77 = vector.extract_strided_slice %75 {offsets = [8, 8], sizes = [8, 8], strides = [1, 1]} : vector<16x16xf32> to vector<8x8xf32>
    %78 = tpu.concatenate %76, %77 in 0 : vector<8x8xf32>, vector<8x8xf32> -> vector<16x8xf32>
    %cst_27 = arith.constant dense<0.000000e+00> : vector<16x8xf32>
    %79 = tpu.matmul %75, %61, %cst_27 {dimension_numbers = #tpu.dot_dimension_numbers<[1], [0], [0], [1], [0, 0, 1, 1], [], []>} : vector<16x16xf32>, vector<16x8xf32>, vector<16x8xf32> -> vector<16x8xf32>
    %c0_28 = arith.constant 0 : index
    %c0_29 = arith.constant 0 : index
    %80 = vector.load %arg5[%c0_28, %c0_29] : memref<32x32xf32, #tpu.memory_space<vmem>>, vector<8x32xf32>
    %cst_30 = arith.constant dense<0.000000e+00> : vector<16x32xf32>
    %81 = tpu.matmul %79, %80, %cst_30 {dimension_numbers = #tpu.dot_dimension_numbers<[1], [0], [0], [1], [0, 0, 1, 1], [], []>} : vector<16x8xf32>, vector<8x32xf32>, vector<16x32xf32> -> vector<16x32xf32>
    %82 = arith.addf %58, %81 : vector<16x32xf32>
    %83 = vector.extract_strided_slice %34 {offsets = [0, 8], sizes = [16, 8], strides = [1, 1]} : vector<16x32xf32> to vector<16x8xf32>
    %84 = vector.extract_strided_slice %35 {offsets = [0, 8], sizes = [16, 8], strides = [1, 1]} : vector<16x32xf32> to vector<16x8xf32>
    %85 = vector.extract_strided_slice %36 {offsets = [0, 8], sizes = [16, 8], strides = [1, 1]} : vector<16x32xf32> to vector<16x8xf32>
    %cst_31 = arith.constant dense<0.000000e+00> : vector<16x16xf32>
    %86 = tpu.matmul %83, %84, %cst_31 {dimension_numbers = #tpu.dot_dimension_numbers<[1], [1], [0], [0], [0, 0, 1, 0], [], []>} : vector<16x8xf32>, vector<16x8xf32>, vector<16x16xf32> -> vector<16x16xf32>
    %cst_32 = arith.constant 0.353553385 : f32
    %87 = vector.broadcast %cst_32 : f32 to vector<16x16xf32>
    %88 = arith.mulf %86, %87 : vector<16x16xf32>
    %cst_33 = arith.constant -1.000000e+30 : f32
    %89 = vector.broadcast %cst_33 : f32 to vector<16x16xf32>
    %90 = arith.select %57, %88, %89 : vector<16x16xi1>, vector<16x16xf32>
    %cst_34 = arith.constant dense<0xFF800000> : vector<16xf32>
    %91 = vector.multi_reduction <maximumf>, %90, %cst_34 [1] : vector<16x16xf32> to vector<16xf32>
    %92 = vector.shape_cast %91 : vector<16xf32> to vector<16x1xf32>
    %93 = vector.broadcast %92 : vector<16x1xf32> to vector<16x16xf32>
    %94 = arith.subf %90, %93 : vector<16x16xf32>
    %95 = math.exp %94 : vector<16x16xf32>
    %cst_35 = arith.constant dense<0.000000e+00> : vector<16xf32>
    %96 = vector.multi_reduction <add>, %95, %cst_35 [1] : vector<16x16xf32> to vector<16xf32>
    %97 = vector.shape_cast %96 : vector<16xf32> to vector<16x1xf32>
    %98 = vector.broadcast %97 : vector<16x1xf32> to vector<16x16xf32>
    %99 = arith.divf %95, %98 : vector<16x16xf32>
    %100 = vector.extract_strided_slice %99 {offsets = [0, 0], sizes = [8, 8], strides = [1, 1]} : vector<16x16xf32> to vector<8x8xf32>
    %101 = vector.extract_strided_slice %99 {offsets = [8, 8], sizes = [8, 8], strides = [1, 1]} : vector<16x16xf32> to vector<8x8xf32>
    %102 = tpu.concatenate %100, %101 in 0 : vector<8x8xf32>, vector<8x8xf32> -> vector<16x8xf32>
    %cst_36 = arith.constant dense<0.000000e+00> : vector<16x8xf32>
    %103 = tpu.matmul %99, %85, %cst_36 {dimension_numbers = #tpu.dot_dimension_numbers<[1], [0], [0], [1], [0, 0, 1, 1], [], []>} : vector<16x16xf32>, vector<16x8xf32>, vector<16x8xf32> -> vector<16x8xf32>
    %c8 = arith.constant 8 : index
    %c0_37 = arith.constant 0 : index
    %104 = vector.load %arg5[%c8, %c0_37] : memref<32x32xf32, #tpu.memory_space<vmem>>, vector<8x32xf32>
    %cst_38 = arith.constant dense<0.000000e+00> : vector<16x32xf32>
    %105 = tpu.matmul %103, %104, %cst_38 {dimension_numbers = #tpu.dot_dimension_numbers<[1], [0], [0], [1], [0, 0, 1, 1], [], []>} : vector<16x8xf32>, vector<8x32xf32>, vector<16x32xf32> -> vector<16x32xf32>
    %106 = arith.addf %82, %105 : vector<16x32xf32>
    %107 = vector.extract_strided_slice %34 {offsets = [0, 16], sizes = [16, 8], strides = [1, 1]} : vector<16x32xf32> to vector<16x8xf32>
    %108 = vector.extract_strided_slice %35 {offsets = [0, 16], sizes = [16, 8], strides = [1, 1]} : vector<16x32xf32> to vector<16x8xf32>
    %109 = vector.extract_strided_slice %36 {offsets = [0, 16], sizes = [16, 8], strides = [1, 1]} : vector<16x32xf32> to vector<16x8xf32>
    %cst_39 = arith.constant dense<0.000000e+00> : vector<16x16xf32>
    %110 = tpu.matmul %107, %108, %cst_39 {dimension_numbers = #tpu.dot_dimension_numbers<[1], [1], [0], [0], [0, 0, 1, 0], [], []>} : vector<16x8xf32>, vector<16x8xf32>, vector<16x16xf32> -> vector<16x16xf32>
    %cst_40 = arith.constant 0.353553385 : f32
    %111 = vector.broadcast %cst_40 : f32 to vector<16x16xf32>
    %112 = arith.mulf %110, %111 : vector<16x16xf32>
    %cst_41 = arith.constant -1.000000e+30 : f32
    %113 = vector.broadcast %cst_41 : f32 to vector<16x16xf32>
    %114 = arith.select %57, %112, %113 : vector<16x16xi1>, vector<16x16xf32>
    %cst_42 = arith.constant dense<0xFF800000> : vector<16xf32>
    %115 = vector.multi_reduction <maximumf>, %114, %cst_42 [1] : vector<16x16xf32> to vector<16xf32>
    %116 = vector.shape_cast %115 : vector<16xf32> to vector<16x1xf32>
    %117 = vector.broadcast %116 : vector<16x1xf32> to vector<16x16xf32>
    %118 = arith.subf %114, %117 : vector<16x16xf32>
    %119 = math.exp %118 : vector<16x16xf32>
    %cst_43 = arith.constant dense<0.000000e+00> : vector<16xf32>
    %120 = vector.multi_reduction <add>, %119, %cst_43 [1] : vector<16x16xf32> to vector<16xf32>
    %121 = vector.shape_cast %120 : vector<16xf32> to vector<16x1xf32>
    %122 = vector.broadcast %121 : vector<16x1xf32> to vector<16x16xf32>
    %123 = arith.divf %119, %122 : vector<16x16xf32>
    %124 = vector.extract_strided_slice %123 {offsets = [0, 0], sizes = [8, 8], strides = [1, 1]} : vector<16x16xf32> to vector<8x8xf32>
    %125 = vector.extract_strided_slice %123 {offsets = [8, 8], sizes = [8, 8], strides = [1, 1]} : vector<16x16xf32> to vector<8x8xf32>
    %126 = tpu.concatenate %124, %125 in 0 : vector<8x8xf32>, vector<8x8xf32> -> vector<16x8xf32>
    %cst_44 = arith.constant dense<0.000000e+00> : vector<16x8xf32>
    %127 = tpu.matmul %123, %109, %cst_44 {dimension_numbers = #tpu.dot_dimension_numbers<[1], [0], [0], [1], [0, 0, 1, 1], [], []>} : vector<16x16xf32>, vector<16x8xf32>, vector<16x8xf32> -> vector<16x8xf32>
    %c16 = arith.constant 16 : index
    %c0_45 = arith.constant 0 : index
    %128 = vector.load %arg5[%c16, %c0_45] : memref<32x32xf32, #tpu.memory_space<vmem>>, vector<8x32xf32>
    %cst_46 = arith.constant dense<0.000000e+00> : vector<16x32xf32>
    %129 = tpu.matmul %127, %128, %cst_46 {dimension_numbers = #tpu.dot_dimension_numbers<[1], [0], [0], [1], [0, 0, 1, 1], [], []>} : vector<16x8xf32>, vector<8x32xf32>, vector<16x32xf32> -> vector<16x32xf32>
    %130 = arith.addf %106, %129 : vector<16x32xf32>
    %131 = vector.extract_strided_slice %34 {offsets = [0, 24], sizes = [16, 8], strides = [1, 1]} : vector<16x32xf32> to vector<16x8xf32>
    %132 = vector.extract_strided_slice %35 {offsets = [0, 24], sizes = [16, 8], strides = [1, 1]} : vector<16x32xf32> to vector<16x8xf32>
    %133 = vector.extract_strided_slice %36 {offsets = [0, 24], sizes = [16, 8], strides = [1, 1]} : vector<16x32xf32> to vector<16x8xf32>
    %cst_47 = arith.constant dense<0.000000e+00> : vector<16x16xf32>
    %134 = tpu.matmul %131, %132, %cst_47 {dimension_numbers = #tpu.dot_dimension_numbers<[1], [1], [0], [0], [0, 0, 1, 0], [], []>} : vector<16x8xf32>, vector<16x8xf32>, vector<16x16xf32> -> vector<16x16xf32>
    %cst_48 = arith.constant 0.353553385 : f32
    %135 = vector.broadcast %cst_48 : f32 to vector<16x16xf32>
    %136 = arith.mulf %134, %135 : vector<16x16xf32>
    %cst_49 = arith.constant -1.000000e+30 : f32
    %137 = vector.broadcast %cst_49 : f32 to vector<16x16xf32>
    %138 = arith.select %57, %136, %137 : vector<16x16xi1>, vector<16x16xf32>
    %cst_50 = arith.constant dense<0xFF800000> : vector<16xf32>
    %139 = vector.multi_reduction <maximumf>, %138, %cst_50 [1] : vector<16x16xf32> to vector<16xf32>
    %140 = vector.shape_cast %139 : vector<16xf32> to vector<16x1xf32>
    %141 = vector.broadcast %140 : vector<16x1xf32> to vector<16x16xf32>
    %142 = arith.subf %138, %141 : vector<16x16xf32>
    %143 = math.exp %142 : vector<16x16xf32>
    %cst_51 = arith.constant dense<0.000000e+00> : vector<16xf32>
    %144 = vector.multi_reduction <add>, %143, %cst_51 [1] : vector<16x16xf32> to vector<16xf32>
    %145 = vector.shape_cast %144 : vector<16xf32> to vector<16x1xf32>
    %146 = vector.broadcast %145 : vector<16x1xf32> to vector<16x16xf32>
    %147 = arith.divf %143, %146 : vector<16x16xf32>
    %148 = vector.extract_strided_slice %147 {offsets = [0, 0], sizes = [8, 8], strides = [1, 1]} : vector<16x16xf32> to vector<8x8xf32>
    %149 = vector.extract_strided_slice %147 {offsets = [8, 8], sizes = [8, 8], strides = [1, 1]} : vector<16x16xf32> to vector<8x8xf32>
    %150 = tpu.concatenate %148, %149 in 0 : vector<8x8xf32>, vector<8x8xf32> -> vector<16x8xf32>
    %cst_52 = arith.constant dense<0.000000e+00> : vector<16x8xf32>
    %151 = tpu.matmul %147, %133, %cst_52 {dimension_numbers = #tpu.dot_dimension_numbers<[1], [0], [0], [1], [0, 0, 1, 1], [], []>} : vector<16x16xf32>, vector<16x8xf32>, vector<16x8xf32> -> vector<16x8xf32>
    %c24 = arith.constant 24 : index
    %c0_53 = arith.constant 0 : index
    %152 = vector.load %arg5[%c24, %c0_53] : memref<32x32xf32, #tpu.memory_space<vmem>>, vector<8x32xf32>
    %cst_54 = arith.constant dense<0.000000e+00> : vector<16x32xf32>
    %153 = tpu.matmul %151, %152, %cst_54 {dimension_numbers = #tpu.dot_dimension_numbers<[1], [0], [0], [1], [0, 0, 1, 1], [], []>} : vector<16x8xf32>, vector<8x32xf32>, vector<16x32xf32> -> vector<16x32xf32>
    %154 = arith.addf %130, %153 : vector<16x32xf32>
    %155 = tpu.concatenate %78, %102, %126, %150 in 1 : vector<16x8xf32>, vector<16x8xf32>, vector<16x8xf32>, vector<16x8xf32> -> vector<16x32xf32>
    %c0_55 = arith.constant 0 : index
    %c0_56 = arith.constant 0 : index
    %156 = vector.load %arg10[%c0_55, %c0_56] : memref<16x32xf32, #tpu.memory_space<vmem>>, vector<16x32xf32>
    tpu.vector_store %arg10[%c0_55, %c0_56], %155 {strides = array<i32>} : memref<16x32xf32, #tpu.memory_space<vmem>>, vector<16x32xf32>,
    %157 = arith.addf %0, %154 : vector<16x32xf32>
    %158 = vector.broadcast %5 : vector<1x32xf32> to vector<16x32xf32>
    %159 = arith.addf %157, %158 : vector<16x32xf32>
    %cst_57 = arith.constant dense<0.000000e+00> : vector<16xf32>
    %160 = vector.multi_reduction <add>, %159, %cst_57 [1] : vector<16x32xf32> to vector<16xf32>
    %161 = vector.shape_cast %160 : vector<16xf32> to vector<16x1xf32>
    %cst_58 = arith.constant 3.200000e+01 : f32
    %162 = vector.broadcast %cst_58 : f32 to vector<16x1xf32>
    %163 = arith.divf %161, %162 : vector<16x1xf32>
    %164 = vector.broadcast %163 : vector<16x1xf32> to vector<16x32xf32>
    %165 = arith.subf %159, %164 : vector<16x32xf32>
    %166 = arith.mulf %165, %165 : vector<16x32xf32>
    %cst_59 = arith.constant dense<0.000000e+00> : vector<16xf32>
    %167 = vector.multi_reduction <add>, %166, %cst_59 [1] : vector<16x32xf32> to vector<16xf32>
    %168 = vector.shape_cast %167 : vector<16xf32> to vector<16x1xf32>
    %cst_60 = arith.constant 3.200000e+01 : f32
    %169 = vector.broadcast %cst_60 : f32 to vector<16x1xf32>
    %170 = arith.divf %168, %169 : vector<16x1xf32>
    %171 = vector.broadcast %163 : vector<16x1xf32> to vector<16x32xf32>
    %172 = arith.subf %159, %171 : vector<16x32xf32>
    %cst_61 = arith.constant 9.99999974E-6 : f32
    %173 = vector.broadcast %cst_61 : f32 to vector<16x1xf32>
    %174 = arith.addf %170, %173 : vector<16x1xf32>
    %175 = math.rsqrt %174 : vector<16x1xf32>
    %176 = vector.broadcast %175 : vector<16x1xf32> to vector<16x32xf32>
    %177 = arith.mulf %172, %176 : vector<16x32xf32>
    %178 = vector.broadcast %3 : vector<1x32xf32> to vector<16x32xf32>
    %179 = arith.mulf %177, %178 : vector<16x32xf32>
    %180 = vector.broadcast %4 : vector<1x32xf32> to vector<16x32xf32>
    %181 = arith.addf %179, %180 : vector<16x32xf32>
    %c0_62 = arith.constant 0 : index
    %c0_63 = arith.constant 0 : index
    %182 = vector.load %arg6[%c0_62, %c0_63] : memref<32x64xf32, #tpu.memory_space<vmem>>, vector<32x64xf32>
    %cst_64 = arith.constant dense<0.000000e+00> : vector<16x64xf32>
    %183 = tpu.matmul %181, %182, %cst_64 {dimension_numbers = #tpu.dot_dimension_numbers<[1], [0], [0], [1], [0, 0, 1, 1], [], []>} : vector<16x32xf32>, vector<32x64xf32>, vector<16x64xf32> -> vector<16x64xf32>
    %c0_65 = arith.constant 0 : index
    %c0_66 = arith.constant 0 : index
    %184 = vector.load %arg7[%c0_65, %c0_66] : memref<1x64xf32, #tpu.memory_space<vmem>>, vector<1x64xf32>
    %185 = vector.broadcast %184 : vector<1x64xf32> to vector<16x64xf32>
    %186 = arith.addf %183, %185 : vector<16x64xf32>
    %187 = arith.mulf %186, %186 : vector<16x64xf32>
    %188 = arith.mulf %186, %187 : vector<16x64xf32>
    %cst_67 = arith.constant 4.471500e-02 : f32
    %189 = vector.broadcast %cst_67 : f32 to vector<16x64xf32>
    %190 = arith.mulf %189, %188 : vector<16x64xf32>
    %191 = arith.addf %186, %190 : vector<16x64xf32>
    %cst_68 = arith.constant 0.797884583 : f32
    %192 = vector.broadcast %cst_68 : f32 to vector<16x64xf32>
    %193 = arith.mulf %192, %191 : vector<16x64xf32>
    %194 = math.tanh %193 : vector<16x64xf32>
    %cst_69 = arith.constant 1.000000e+00 : f32
    %195 = vector.broadcast %cst_69 : f32 to vector<16x64xf32>
    %196 = arith.addf %195, %194 : vector<16x64xf32>
    %cst_70 = arith.constant 5.000000e-01 : f32
    %197 = vector.broadcast %cst_70 : f32 to vector<16x64xf32>
    %198 = arith.mulf %197, %196 : vector<16x64xf32>
    %199 = arith.mulf %186, %198 : vector<16x64xf32>
    %c0_71 = arith.constant 0 : index
    %c0_72 = arith.constant 0 : index
    %200 = vector.load %arg8[%c0_71, %c0_72] : memref<64x32xf32, #tpu.memory_space<vmem>>, vector<64x32xf32>
    %cst_73 = arith.constant dense<0.000000e+00> : vector<16x32xf32>
    %201 = tpu.matmul %199, %200, %cst_73 {dimension_numbers = #tpu.dot_dimension_numbers<[1], [0], [0], [1], [0, 0, 1, 1], [], []>} : vector<16x64xf32>, vector<64x32xf32>, vector<16x32xf32> -> vector<16x32xf32>
    %202 = vector.broadcast %6 : vector<1x32xf32> to vector<16x32xf32>
    %203 = arith.addf %201, %202 : vector<16x32xf32>
    %204 = arith.addf %159, %203 : vector<16x32xf32>
    %c0_74 = arith.constant 0 : index
    %c0_75 = arith.constant 0 : index
    %205 = vector.load %arg9[%c0_74, %c0_75] : memref<16x32xf32, #tpu.memory_space<vmem>>, vector<16x32xf32>
    tpu.vector_store %arg9[%c0_74, %c0_75], %204 {strides = array<i32>} : memref<16x32xf32, #tpu.memory_space<vmem>>, vector<16x32xf32>,
    return
  }
  func.func @transform_0(%arg0: i32) -> (i32, i32) {
    %c0_i32 = arith.constant 0 : i32
    %c0_i32_0 = arith.constant 0 : i32
    %c0_i32_1 = arith.constant 0 : i32
    return %c0_i32, %c0_i32_0 : i32, i32
  }
  func.func @transform_1(%arg0: i32) -> (i32, i32) {
    %c0_i32 = arith.constant 0 : i32
    %c0_i32_0 = arith.constant 0 : i32
    %c0_i32_1 = arith.constant 0 : i32
    return %c0_i32, %c0_i32_0 : i32, i32
  }
  func.func @transform_2(%arg0: i32) -> (i32, i32) {
    %c0_i32 = arith.constant 0 : i32
    %c0_i32_0 = arith.constant 0 : i32
    %c0_i32_1 = arith.constant 0 : i32
    return %c0_i32, %c0_i32_0 : i32, i32
  }
  func.func @transform_3(%arg0: i32) -> (i32, i32) {
    %c0_i32 = arith.constant 0 : i32
    %c0_i32_0 = arith.constant 0 : i32
    %c0_i32_1 = arith.constant 0 : i32
    return %c0_i32, %c0_i32_0 : i32, i32
  }
  func.func @transform_4(%arg0: i32) -> (i32, i32) {
    %c0_i32 = arith.constant 0 : i32
    %c0_i32_0 = arith.constant 0 : i32
    %c0_i32_1 = arith.constant 0 : i32
    return %c0_i32, %c0_i32_0 : i32, i32
  }
  func.func @transform_5(%arg0: i32) -> (i32, i32) {
    %c0_i32 = arith.constant 0 : i32
    %c0_i32_0 = arith.constant 0 : i32
    %c0_i32_1 = arith.constant 0 : i32
    return %c0_i32, %c0_i32_0 : i32, i32
  }
  func.func @transform_6(%arg0: i32) -> (i32, i32) {
    %c0_i32 = arith.constant 0 : i32
    %c0_i32_0 = arith.constant 0 : i32
    %c0_i32_1 = arith.constant 0 : i32
    return %c0_i32, %c0_i32_0 : i32, i32
  }
  func.func @transform_7(%arg0: i32) -> (i32, i32) {
    %c0_i32 = arith.constant 0 : i32
    %c0_i32_0 = arith.constant 0 : i32
    %c0_i32_1 = arith.constant 0 : i32
    return %c0_i32, %c0_i32_0 : i32, i32
  }
  func.func @transform_8(%arg0: i32) -> (i32, i32) {
    %c0_i32 = arith.constant 0 : i32
    %c0_i32_0 = arith.constant 0 : i32
    %c0_i32_1 = arith.constant 0 : i32
    return %c0_i32, %c0_i32_0 : i32, i32
  }
  func.func @transform_9(%arg0: i32) -> (i32, i32) {
    %c0_i32 = arith.constant 0 : i32
    %c0_i32_0 = arith.constant 0 : i32
    %c0_i32_1 = arith.constant 0 : i32
    return %c0_i32, %c0_i32_0 : i32, i32
  }
}

</mosaic_0001>

<bundles_post_ra>
// kernel: tpu_custom_call.1
= control target key start
LH: loop header
LB: loop body
LE: loop exit
PB: predicated region body
PF: predicated region fallthrough
CT: control target
= control target key end

     0   :  { %15 = vsyncpa [#allocation3], 0  ;;  %s2577_s0 = inlined_call_operand.hbm [shape: f32[16,32], index: 0, kind: input, shape index: {}]   ;;  %s2578_s1 = inlined_call_operand.hbm [shape: f32[6,32], index: 1, kind: input, shape index: {}]   ;;  %s2579_s2 = inlined_call_operand.vmem [shape: f32[32,96], index: 2, kind: input, shape index: {}]   ;;  %s2580_s3 = inlined_call_operand.vmem [shape: f32[1,96], index: 3, kind: input, shape index: {}]   ;;  %s2581_s4 = inlined_call_operand.vmem [shape: f32[32,32], index: 4, kind: input, shape index: {}]   ;;  %s2582_s5 = inlined_call_operand.vmem [shape: f32[32,64], index: 5, kind: input, shape index: {}]   ;;  %s2583_s6 = inlined_call_operand.vmem [shape: f32[1,64], index: 6, kind: input, shape index: {}]   ;;  %s2584_s7 = inlined_call_operand.vmem [shape: f32[64,32], index: 7, kind: input, shape index: {}]   ;;  %s2585_s8 = inlined_call_operand.hbm [shape: f32[16,32], index: 8, kind: output, shape index: {0}]   ;;  %s2586_s9 = inlined_call_operand.hbm [shape: f32[16,32], index: 9, kind: output, shape index: {1}]  }
   0x1   :  { %16 = vsyncpa [#allocation6], 0 }
   0x2   :  { %17 = vsyncpa [#allocation4], 0 }
   0x3   :  { %18 = vsyncpa [#allocation9], 0  ;;  %s2205_s30 = smov [#allocation2]   ;;  %s2109_s13 = scalar_lea.hbm %s2577_s0, 256 }
   0x4   :  { %s24_s10 = sshll.u32 %s2205_s30, 4  ;;  %p2110_p0 = scmp.ne.s32.totalorder %s2577_s0, %s2109_s13  ;;  %s25_s10 = int_to_ptr.vmem [resolvable:$true] %s24_s10 }
   0x5   :  { %p2113_p1 = scmp.lt.u32.totalorder %s2109_s13, %s2577_s0 }
   0x7   :  { %p2115_p2 = pnand %p2113_p1, %p2110_p0 }
   0x9   :  { %2118 = shalt.err (!%p2115_p2)
}
   0xa   :  { %s2119_s18 = scalar_lea.vmem %s25_s10, 256  ;;  %p2124_p4 = scmp.lt.s32.totalorder %s25_s10, %s25_s10 }
   0xb   :  { %p2120_p3 = scmp.ne.s32.totalorder %s25_s10, %s2119_s18  ;;  %p2125_p5 = scmp.lt.s32.totalorder %s2119_s18, %s2119_s18 }
   0xd   :  { %p2126_p6 = por %p2125_p5, %p2124_p4 }
   0xf   :  { %p2127_p7 = pnand %p2126_p6, %p2120_p3 }
  0x11   :  { %2130 = shalt.err (!%p2127_p7)
}
  0x12   :  { %s2206_s19 = smov 128   ;;  %s2207_s20 = smov 8  }
  0x13   :  { %30 = dma.hbm_to_vmem [thread:$0]  %s2577_s0, 256, %s25_s10, [#allocation3], %s2206_s19, %s2206_s19, %s2207_s20  }
  0x14   :  { %s2208_s23 = smov [#allocation5]   ;;  %s2131_s27 = scalar_lea.hbm %s2578_s1, 128 }
  0x15   :  { %s37_s24 = sshll.u32 %s2208_s23, 4  ;;  %p2132_p8 = scmp.ne.s32.totalorder %s2578_s1, %s2131_s27  ;;  %s38_s24 = int_to_ptr.vmem [resolvable:$true] %s37_s24 }
  0x16   :  { %p2135_p9 = scmp.lt.u32.totalorder %s2131_s27, %s2578_s1 }
  0x18   :  { %p2137_p10 = pnand %p2135_p9, %p2132_p8 }
  0x1a   :  { %2140 = shalt.err (!%p2137_p10)
}
  0x1b   :  { %s2141_s12 = scalar_lea.vmem %s38_s24, 128  ;;  %p2146_p12 = scmp.lt.s32.totalorder %s38_s24, %s38_s24 }
  0x1c   :  { %p2142_p11 = scmp.ne.s32.totalorder %s38_s24, %s2141_s12  ;;  %p2147_p13 = scmp.lt.s32.totalorder %s2141_s12, %s2141_s12 }
  0x1e   :  { %p2148_p0 = por %p2147_p13, %p2146_p12 }
  0x20   :  { %p2149_p1 = pnand %p2148_p0, %p2142_p11 }
  0x22   :  { %2152 = shalt.err (!%p2149_p1)
}
  0x23   :  { %40 = dma.hbm_to_vmem [thread:$0]  %s2578_s1, 128, %s38_s24, [#allocation6]  }
  0x24   :  { %2197 = dma.done.wait [#allocation3], 256  }
  0x25   :  { %2198 = vsyncadd [#allocation3], 4294967040 }
  0x26   :  { %2199 = dma.done.wait [#allocation6], 128  }
  0x27   :  { %2200 = vsyncadd [#allocation6], 4294967168  ;;  %vm67_vm0 = vcmask 261120   ;;  %v2301_v0 = vld [vmem:[#allocation2] sm:$0xff]  ;;  %v2303_v1 = vld [vmem:[#allocation2 + $0x8] sm:$0xff]  ;;  %vm233_vm1 = vcmask 64512   ;;  %v199_v59 = vlaneseq }
  0x28   :  { %v68_v2 = vsel %vm67_vm0, %v2301_v0, 0.0  ;;  %v71_v3 = vsel %vm67_vm0, %v2303_v1, 0.0  ;;  %v107_v14 = vld [vmem:[%s2579_s2] sm:$0xff]  ;;  %v108_v15 = vld [vmem:[%s2579_s2 + $0x8] sm:$0xff]  ;;  %v109_v16 = vld [vmem:[%s2579_s2 + $0x10] sm:$0xff]  ;;  %s2209_s23 = smov 88  }
  0x29   :  { %69 = vadd.xlane.f32.xlu0 %v68_v2  ;;  %v1928_v17 = vpack.c.bf16 %v108_v15, %v107_v14  ;;  %v110_v18 = vld [vmem:[%s2579_s2 + $0x18] sm:$0xff]  ;;  %v1699_v27 = vld [vmem:[#allocation5] ss:$0 sm:$0xff]  ;;  %v1700_v29 = vld [vmem:[#allocation5 + $0x1] ss:$0 sm:$0xff]  ;;  %s2210_s24 = smov 96  }
  0x2a   :  { %v1932_v19 = vpack.c.bf16 %v110_v18, %v109_v16  ;;  %v1701_v36 = vld [vmem:[%s2580_s3] ss:$0 sm:$0xff]  ;;  %s2211_s3 = smov 120   ;;  %s2212_s25 = smov 80   ;;  %vm2351_vm2 = vmpackc.low %vm233_vm1, %vm233_vm1  ;;  %v200_v60 = vshrl.u32 %v199_v59, 7  ;;  %v203_v61 = vand.u32 127, %v199_v59 }
  0x2b   :  { %1929 = vmatprep.subr.bf16.mxu1 %v1928_v17  ;;  %s2213_s26 = smov 112   ;;  %vm321_vm10 = vcmask 130048   ;;  %s2214_s27 = smov 64   ;;  %vm1406_vm12 = vcmask 195584   ;;  %vm1579_vm13 = vcmask 523264  }
  0x2c   :  { %1931 = vmatpush3.bf16.msra.mxu1 %v1928_v17  ;;  %v201_v62 = vadd.s32 8, %v200_v60  ;;  %vm217_vm3 = vcmp.ge.s32.totalorder %v203_v61, 8  ;;  %vm220_vm4 = vcmp.lt.s32.totalorder %v203_v61, 16  ;;  %vm204_vm7 = vcmp.le.s32.totalorder %v203_v61, %v200_v60  ;;  %s2215_s28 = smov 72   ;;  %s2216_s29 = smov 104  }
  0x2d   :  { %72 = vadd.xlane.f32.xlu0 %v71_v3  ;;  %1933 = vmatprep.subr.bf16.mxu1 %v1932_v19  ;;  %vm222_vm6 = vmand %vm217_vm3, %vm220_vm4  ;;  %vm208_vm8 = vcmp.lt.s32.totalorder %v203_v61, 8  ;;  %s2217_s30 = smov 56   ;;  %s2218_s1 = smov 48  }
  0x2e   :  { %vm205_vm5 = vcmp.le.s32.totalorder %v203_v61, %v201_v62  ;;  %vm2377_vm11 = vmand %vm204_vm7, %vm208_vm8  ;;  %s2219_s15 = smov 40  }
  0x2f   :  { %vm2373_vm9 = vmand %vm205_vm5, %vm222_vm6 }
  0x30   :  { %1935 = vmatpush3.bf16.msra.mxu1 %v1932_v19 }
  0xb6   :  { %v70_v4 = vpop.xlane.xlu0 %69 }
  0xb7   :  { %v75_v5 = vmul.f32 0.03125, %v70_v4 }
  0xb9   :  { %v77_v6 = vsub.f32 %v2301_v0, %v75_v5  ;;  %v1010_v5 = vld [vmem:[%s2581_s4 + $0x10] sm:$0xff] }
  0xba   :  { %v73_v7 = vpop.xlane.xlu0 %72 }
  0xbb   :  { %v76_v8 = vmul.f32 0.03125, %v73_v7  ;;  %v79_v9 = vmul.f32 %v77_v6, %v77_v6 }
  0xbd   :  { %v78_v10 = vsub.f32 %v2303_v1, %v76_v8  ;;  %v81_v11 = vsel %vm67_vm0, %v79_v9, 0.0 }
  0xbe   :  { %82 = vadd.xlane.f32.xlu1 %v81_v11 }
  0xbf   :  { %v80_v12 = vmul.f32 %v78_v10, %v78_v10 }
  0xc1   :  { %v84_v13 = vsel %vm67_vm0, %v80_v12, 0.0 }
  0xc2   :  { %85 = vadd.xlane.f32.xlu1 %v84_v13 }
 0x14b   :  { %v83_v20 = vpop.xlane.xlu1 %82 }
 0x14c   :  { %v87_v21 = vmul.f32 0.03125, %v83_v20 }
 0x14e   :  { %v89_v22 = vadd.f32 1e-05, %v87_v21 }
 0x14f   :  { %v86_v23 = vpop.xlane.xlu1 %85 }
 0x150   :  { %2065 = vrsqrt.f32 %v89_v22  ;;  %v88_v24 = vmul.f32 0.03125, %v86_v23 }
 0x152   :  { %v90_v25 = vadd.f32 1e-05, %v88_v24 }
 0x154   :  { %2067 = vrsqrt.f32 %v90_v25 }
 0x15a   :  { %v2066_v26 = vpop.eup %2065 }
 0x15b   :  { %v93_v28 = vmul.f32 %v2066_v26, %v77_v6 }
 0x15d   :  { %v99_v30 = vmul.f32 %v1699_v27, %v93_v28 }
 0x15e   :  { %v2068_v31 = vpop.eup %2067 }
 0x15f   :  { %v94_v32 = vmul.f32 %v2068_v31, %v78_v10  ;;  %v105_v33 = vadd.f32 %v1700_v29, %v99_v30 }
 0x161   :  { %v100_v34 = vmul.f32 %v1699_v27, %v94_v32  ;;  %1819 = vmatprep.mubr.msk.f32.mxu1 %vm67_vm0, %v105_v33 }
 0x163   :  { %v106_v35 = vadd.f32 %v1700_v29, %v100_v34 }
 0x165   :  { %1820 = vmatmul.mubr.msk.f32.vlgmr.msra.gmra.mrb[0].mxu1 %vm67_vm0, %v106_v35 }
 0x238   :  { %v1821_v37 = vpop.f32.mrb[0].mxu1 }
 0x239   :  { %v2330_v38 = vadd.f32 %v1821_v37, %v1701_v36  ;;  %v190_v39 = vpop.f32.mrb[1].mxu1 }
 0x23a   :  { %v2332_v40 = vadd.f32 %v1701_v36, %v190_v39 }
 0x23c   :  { %1826 = vmatprep.mubr.msk.f32.mxu1 %vm233_vm1, %v2332_v40  ;;  %v2338_v41 = vpack.i.bf16 %v2330_v38, %v2332_v40 }
 0x23e   :  { %2031 = vrot.lane.b32.xlu1 %v2338_v41, %s2209_s23  ;;  %2026 = vrot.lane.b32.xlu0 %v2338_v41, %s2210_s24 }
 0x242   :  { %435 = vrot.lane.b32.xlu1 %v2332_v40, %s2211_s3  ;;  %2036 = vrot.lane.b32.xlu0 %v2338_v41, %s2212_s25 }
 0x246   :  { %437 = vrot.lane.b32.xlu1 %v2330_v38, %s2211_s3  ;;  %806 = vrot.lane.b32.xlu0 %v2330_v38, %s2213_s26 }
 0x24a   :  { %804 = vrot.lane.b32.xlu1 %v2332_v40, %s2213_s26  ;;  %s2220_s26 = smov 16  }
 0x2b0   :  { %v2032_v42 = vpop.permute.xlu1 %2031  ;;  %v2027_v43 = vpop.permute.xlu0 %2026 }
 0x2b1   :  { %v2034_v44 = vunpack.i.h.bf16 %v2032_v42  ;;  %v2033_v45 = vunpack.i.l.bf16 %v2032_v42  ;;  %v2029_v46 = vunpack.i.h.bf16 %v2027_v43  ;;  %v2028_v47 = vunpack.i.l.bf16 %v2027_v43 }
 0x2b3   :  { %v1936_v49 = vpack.c.bf16 %v2029_v46, %v2028_v47  ;;  %v1946_v50 = vpack.c.bf16 %v2034_v44, %v2033_v45 }
 0x2b4   :  { %v2037_v51 = vpop.permute.xlu0 %2036  ;;  %v436_v52 = vpop.permute.xlu1 %435 }
 0x2b5   :  { %1938 = vmatprep.subr.msk.bf16.mxu1 %vm2351_vm2, %v1936_v49  ;;  %v2039_v53 = vunpack.i.h.bf16 %v2037_v51  ;;  %v2038_v54 = vunpack.i.l.bf16 %v2037_v51 }
 0x2b6   :  { %1941 = vmatpush3.bf16.xpose.msk.msra.mxu1 %vm2351_vm2, %v1936_v49 }
 0x2b7   :  { %1948 = vmatprep.subr.msk.bf16.mxu1 %vm2351_vm2, %v1946_v50  ;;  %v1956_v55 = vpack.c.bf16 %v2039_v53, %v2038_v54 }
 0x2b8   :  { %v438_v56 = vpop.permute.xlu1 %437  ;;  %v807_v58 = vpop.permute.xlu0 %806 }
 0x2bc   :  { %v805_v57 = vpop.permute.xlu1 %804 }
 0x2bd   :  { %1827 = vmatmul.mubr.msk.f32.vlgmr.msra.gmra.mrb[2].mxu1 %vm233_vm1, %v2330_v38 }
 0x2be   :  { %1951 = vmatpush3.bf16.xpose.msk.msra.mxu1 %vm2351_vm2, %v1946_v50  ;;  %1840 = vmatprep.mubr.msk.f32.mxu1 %vm233_vm1, %v436_v52 }
 0x2bf   :  { %1958 = vmatprep.subr.msk.bf16.mxu1 %vm2351_vm2, %v1956_v55 }
 0x2c5   :  { %1841 = vmatmul.mubr.msk.f32.vlgmr.msra.gmra.mrb[4].mxu1 %vm233_vm1, %v438_v56 }
 0x2c6   :  { %1961 = vmatpush3.bf16.xpose.msk.msra.mxu1 %vm2351_vm2, %v1956_v55  ;;  %1864 = vmatprep.mubr.msk.f32.mxu1 %vm233_vm1, %v805_v57 }
 0x2cd   :  { %1865 = vmatmul.mubr.msk.f32.vlgmr.msra.gmra.mrb[6].mxu1 %vm233_vm1, %v807_v58 }
 0x390   :  { %v1828_v63 = vpop.f32.mrb[2].mxu1 }
 0x391   :  { %v318_v3 = vmul.f32 0.35355338, %v1828_v63  ;;  %v308_v4 = vpop.f32.mrb[3].mxu1 }
 0x392   :  { %v317_v6 = vmul.f32 0.35355338, %v308_v4 }
 0x393   :  { %v320_v7 = vsel %vm2373_vm9, %v318_v3, -1e+30 }
 0x394   :  { %v325_v8 = vsel %vm321_vm10, %v320_v7, -inf  ;;  %v319_v9 = vsel %vm2377_vm11, %v317_v6, -1e+30 }
 0x395   :  { %326 = vmax.xlane.f32.xlu0 %v325_v8  ;;  %v322_v10 = vsel %vm321_vm10, %v319_v9, -inf }
 0x396   :  { %323 = vmax.xlane.f32.xlu1 %v322_v10 }
 0x398   :  { %v1842_v11 = vpop.f32.mrb[4].mxu1 }
 0x399   :  { %v517_v12 = vpop.f32.mrb[5].mxu1  ;;  %v527_v13 = vmul.f32 0.35355338, %v1842_v11 }
 0x39a   :  { %v526_v14 = vmul.f32 0.35355338, %v517_v12 }
 0x39b   :  { %v529_v17 = vsel %vm2373_vm9, %v527_v13, -1e+30 }
 0x39c   :  { %v528_v15 = vsel %vm2377_vm11, %v526_v14, -1e+30  ;;  %v533_v20 = vsel %vm321_vm10, %v529_v17, -inf }
 0x39d   :  { %v530_v16 = vsel %vm321_vm10, %v528_v15, -inf }
 0x39e   :  { %531 = vmax.xlane.f32.xlu0 %v530_v16 }
 0x3a0   :  { %v1866_v18 = vpop.f32.mrb[6].mxu1 }
 0x3a1   :  { %v886_v19 = vpop.f32.mrb[7].mxu1  ;;  %v896_v47 = vmul.f32 0.35355338, %v1866_v18 }
 0x3a2   :  { %534 = vmax.xlane.f32.xlu0 %v533_v20  ;;  %v895_v44 = vmul.f32 0.35355338, %v886_v19 }
 0x3a3   :  { %v898_v49 = vsel %vm2373_vm9, %v896_v47, -1e+30 }
 0x3a4   :  { %v897_v45 = vsel %vm2377_vm11, %v895_v44, -1e+30  ;;  %v902_v50 = vsel %vm321_vm10, %v898_v49, -inf }
 0x3a5   :  { %v899_v46 = vsel %vm321_vm10, %v897_v45, -inf }
 0x422   :  { %v327_v21 = vpop.xlane.xlu0 %326 }
 0x423   :  { %v329_v22 = vsub.f32 %v320_v7, %v327_v21  ;;  %v324_v23 = vpop.xlane.xlu1 %323 }
 0x424   :  { %v328_v24 = vsub.f32 %v319_v9, %v324_v23 }
 0x425   :  { %v332_v25 = vmul.f32 1.442695, %v329_v22 }
 0x426   :  { %v330_v26 = vmul.f32 1.442695, %v328_v24  ;;  %v641_v24 = vld [vmem:[%s2581_s4 + $0x8] sm:$0xff] }
 0x427   :  { %2069 = vpow2.f32 %v332_v25  ;;  %v434_v25 = vld [vmem:[%s2581_s4] sm:$0xff] }
 0x428   :  { %2071 = vpow2.f32 %v330_v26 }
 0x42b   :  { %v532_v27 = vpop.xlane.xlu0 %531 }
 0x42c   :  { %v536_v28 = vsub.f32 %v528_v15, %v532_v27 }
 0x42e   :  { %v538_v29 = vmul.f32 1.442695, %v536_v28 }
 0x42f   :  { %v535_v30 = vpop.xlane.xlu0 %534 }
 0x430   :  { %2073 = vpow2.f32 %v538_v29  ;;  %v537_v31 = vsub.f32 %v529_v17, %v535_v30 }
 0x431   :  { %v2070_v32 = vpop.eup %2069 }
 0x432   :  { %v2072_v33 = vpop.eup %2071  ;;  %v540_v34 = vmul.f32 1.442695, %v537_v31  ;;  %v337_v35 = vsel %vm321_vm10, %v2070_v32, 0.0 }
 0x433   :  { %338 = vadd.xlane.f32.xlu0 %v337_v35  ;;  %v334_v36 = vsel %vm321_vm10, %v2072_v33, 0.0 }
 0x434   :  { %2075 = vpow2.f32 %v540_v34  ;;  %335 = vadd.xlane.f32.xlu1 %v334_v36 }
 0x43a   :  { %v2074_v37 = vpop.eup %2073 }
 0x43b   :  { %v542_v39 = vsel %vm321_vm10, %v2074_v37, 0.0 }
 0x43c   :  { %543 = vadd.xlane.f32.xlu1 %v542_v39 }
 0x43e   :  { %v2076_v42 = vpop.eup %2075 }
 0x43f   :  { %v545_v43 = vsel %vm321_vm10, %v2076_v42, 0.0 }
 0x440   :  { %546 = vadd.xlane.f32.xlu0 %v545_v43 }
 0x44d   :  { %2041 = vrot.lane.b32.xlu1 %v2338_v41, %s2214_s27 }
 0x451   :  { %2051 = vrot.lane.b32.xlu1 %v2338_v41, %s2215_s28 }
 0x455   :  { %1094 = vrot.lane.b32.xlu1 %v2332_v40, %s2216_s29 }
 0x456   :  { %2046 = vrot.lane.b32.xlu0 %v2338_v41, %s2217_s30 }
 0x459   :  { %1096 = vrot.lane.b32.xlu1 %v2330_v38, %s2216_s29 }
 0x475   :  { %900 = vmax.xlane.f32.xlu0 %v899_v46 }
 0x47d   :  { %903 = vmax.xlane.f32.xlu1 %v902_v50 }
 0x4c0   :  { %v339_v51 = vpop.xlane.xlu0 %338 }
 0x4c1   :  { %v336_v40 = vpop.xlane.xlu1 %335 }
 0x4c2   :  { %2077 = vrcp.f32 %v336_v40 }
 0x4c3   :  { %2079 = vrcp.f32 %v339_v51 }
 0x4c9   :  { %v544_v52 = vpop.xlane.xlu1 %543 }
 0x4ca   :  { %2081 = vrcp.f32 %v544_v52 }
 0x4cc   :  { %v2078_v38 = vpop.eup %2077 }
 0x4cd   :  { %v547_v53 = vpop.xlane.xlu0 %546  ;;  %v2042_v54 = vpop.permute.xlu1 %2041  ;;  %v2408_v55 = vmul.f32 %v2078_v38, %v2072_v33 }
 0x4ce   :  { %2083 = vrcp.f32 %v547_v53  ;;  %v2044_v56 = vunpack.i.h.bf16 %v2042_v54  ;;  %v2043_v57 = vunpack.i.l.bf16 %v2042_v54  ;;  %v2080_v59 = vpop.eup %2079 }
 0x4cf   :  { %1833 = vmatprep.mubr.msk.f32.mxu0 %vm321_vm10, %v2408_v55  ;;  %v2412_v9 = vmul.f32 %v2080_v59, %v2070_v32 }
 0x4d0   :  { %v1942_v58 = vpack.c.bf16 %v2044_v56, %v2043_v57 }
 0x4d1   :  { %v2047_v60 = vpop.permute.xlu0 %2046  ;;  %v2052_v61 = vpop.permute.xlu1 %2051 }
 0x4d2   :  { %v2049_v62 = vunpack.i.h.bf16 %v2047_v60  ;;  %v2048_v63 = vunpack.i.l.bf16 %v2047_v60  ;;  %v2054_v3 = vunpack.i.h.bf16 %v2052_v61  ;;  %v2053_v4 = vunpack.i.l.bf16 %v2052_v61  ;;  %1943 = vmatprep.subr.bf16.mxu0 %v1942_v58 }
 0x4d3   :  { %1945 = vmatpush3.bf16.msra.mxu0 %v1942_v58 }
 0x4d4   :  { %v2082_v6 = vpop.eup %2081  ;;  %v1952_v7 = vpack.c.bf16 %v2049_v62, %v2048_v63  ;;  %v1966_v8 = vpack.c.bf16 %v2054_v3, %v2053_v4 }
 0x4d5   :  { %v1095_v10 = vpop.permute.xlu1 %1094  ;;  %v2414_v11 = vmul.f32 %v2082_v6, %v2074_v37 }
 0x4d6   :  { %1834 = vmatmul.mubr.msk.f32.vlgmr.msra.gmra.mrb[0].mxu0 %vm321_vm10, %v2412_v9  ;;  %1953 = vmatprep.subr.bf16.mxu0 %v1952_v7 }
 0x4d7   :  { %1968 = vmatprep.subr.msk.bf16.mxu1 %vm2351_vm2, %v1966_v8  ;;  %1883 = vmatprep.mubr.msk.f32.mxu1 %vm233_vm1, %v1095_v10 }
 0x4d8   :  { %v2084_v12 = vpop.eup %2083  ;;  %1955 = vmatpush3.bf16.msra.mxu0 %v1952_v7  ;;  %1847 = vmatprep.mubr.msk.f32.mxu0 %vm321_vm10, %v2414_v11 }
 0x4d9   :  { %v2423_v13 = vmul.f32 %v2084_v12, %v2076_v42  ;;  %1971 = vmatpush3.bf16.xpose.msk.msra.mxu1 %vm2351_vm2, %v1966_v8  ;;  %v1097_v14 = vpop.permute.xlu1 %1096  ;;  %1850 = vmatprep.subr.mxu0 %v641_v24  ;;  %v1300_v8 = vld [vmem:[%s2581_s4 + $0x18] sm:$0xff] }
 0x4db   :  { %1848 = vmatmul.mubr.msk.f32.vlgmr.msra.gmra.mrb[2].mxu0 %vm321_vm10, %v2423_v13 }
 0x4dc   :  { %1851 = vmatpush3.msra.mxu0 %v641_v24 }
 0x4dd   :  { %1855 = vmatprep.subr.mxu0 %v434_v25 }
 0x4e0   :  { %1884 = vmatmul.mubr.msk.f32.vlgmr.msra.gmra.mrb[8].mxu1 %vm233_vm1, %v1097_v14 }
 0x502   :  { %v901_v15 = vpop.xlane.xlu0 %900 }
 0x503   :  { %v905_v16 = vsub.f32 %v897_v45, %v901_v15 }
 0x505   :  { %v907_v19 = vmul.f32 1.442695, %v905_v16 }
 0x50a   :  { %v904_v17 = vpop.xlane.xlu1 %903 }
 0x50b   :  { %v906_v18 = vsub.f32 %v898_v49, %v904_v17  ;;  %v1736_v17 = vld [vmem:[#allocation5 + $0x4] ss:$0 sm:$0xff] }
 0x50d   :  { %v909_v20 = vmul.f32 1.442695, %v906_v18 }
 0x50f   :  { %2085 = vpow2.f32 %v909_v20 }
 0x510   :  { %2087 = vpow2.f32 %v907_v19 }
 0x519   :  { %v2086_v21 = vpop.eup %2085 }
 0x51a   :  { %v914_v22 = vsel %vm321_vm10, %v2086_v21, 0.0  ;;  %v2088_v23 = vpop.eup %2087 }
 0x51b   :  { %915 = vadd.xlane.f32.xlu0 %v914_v22  ;;  %v911_v48 = vsel %vm321_vm10, %v2088_v23, 0.0 }
 0x51f   :  { %912 = vadd.xlane.f32.xlu0 %v911_v48 }
 0x535   :  { %2056 = vrot.lane.b32.xlu0 %v2338_v41, %s2218_s1 }
 0x5a8   :  { %v916_v26 = vpop.xlane.xlu0 %915 }
 0x5a9   :  { %v1835_v27 = vpop.f32.mrb[0].mxu0 }
 0x5aa   :  { %v425_v28 = vpop.f32.mrb[1].mxu0 }
 0x5ac   :  { %v913_v29 = vpop.xlane.xlu0 %912 }
 0x5ad   :  { %2089 = vrcp.f32 %v913_v29 }
 0x5ae   :  { %2091 = vrcp.f32 %v916_v26  ;;  %v1849_v30 = vpop.f32.mrb[2].mxu0 }
 0x5af   :  { %v632_v31 = vpop.f32.mrb[3].mxu0 }
 0x5b0   :  { %v2057_v32 = vpop.permute.xlu0 %2056  ;;  %1852 = vmatprep.mubr.msk.f32.mxu0 %vm233_vm1, %v632_v31 }
 0x5b1   :  { %v2059_v33 = vunpack.i.h.bf16 %v2057_v32  ;;  %v2058_v34 = vunpack.i.l.bf16 %v2057_v32  ;;  %1853 = vmatmul.mubr.msk.f32.vlgmr.msra.gmra.mrb[4].mxu0 %vm233_vm1, %v1849_v30 }
 0x5b2   :  { %1857 = vmatprep.mubr.msk.f32.mxu0 %vm233_vm1, %v425_v28  ;;  %1856 = vmatpush3.msra.mxu0 %v434_v25 }
 0x5b3   :  { %v1962_v35 = vpack.c.bf16 %v2059_v33, %v2058_v34  ;;  %v1885_v36 = vpop.f32.mrb[8].mxu1  ;;  %v1458_v33 = vld [vmem:[%s2582_s5 + $0x8] sm:$0xff] }
 0x5b4   :  { %v1176_v37 = vpop.f32.mrb[9].mxu1  ;;  %v1186_v39 = vmul.f32 0.35355338, %v1885_v36 }
 0x5b5   :  { %v1185_v42 = vmul.f32 0.35355338, %v1176_v37  ;;  %1963 = vmatprep.subr.bf16.mxu0 %v1962_v35 }
 0x5b6   :  { %v1188_v49 = vsel %vm2373_vm9, %v1186_v39, -1e+30 }
 0x5b7   :  { %v2090_v43 = vpop.eup %2089  ;;  %v1187_v44 = vsel %vm2377_vm11, %v1185_v42, -1e+30  ;;  %v1192_v40 = vsel %vm321_vm10, %v1188_v49, -inf }
 0x5b8   :  { %v2092_v45 = vpop.eup %2091  ;;  %v1189_v46 = vsel %vm321_vm10, %v1187_v44, -inf  ;;  %v2445_v47 = vmul.f32 %v2090_v43, %v2088_v23 }
 0x5b9   :  { %1190 = vmax.xlane.f32.xlu1 %v1189_v46  ;;  %1858 = vmatmul.mubr.msk.f32.vlgmr.msra.gmra.mrb[4].mxu0 %vm233_vm1, %v1835_v27  ;;  %v920_v50 = vmul.f32 %v2092_v45, %v2086_v21 }
 0x5ba   :  { %1965 = vmatpush3.bf16.msra.mxu0 %v1962_v35  ;;  %1871 = vmatprep.mubr.msk.f32.mxu0 %vm321_vm10, %v2445_v47  ;;  %v1459_v35 = vld [vmem:[%s2582_s5 + $0x10] sm:$0xff] }
 0x5bb   :  { %1874 = vmatprep.subr.mxu0 %v1010_v5 }
 0x5bd   :  { %1193 = vmax.xlane.f32.xlu1 %v1192_v40  ;;  %1872 = vmatmul.mubr.msk.f32.vlgmr.msra.gmra.mrb[6].mxu0 %vm321_vm10, %v920_v50  ;;  %v1737_v40 = vld [vmem:[#allocation5 + $0x2] ss:$0 sm:$0xff] }
 0x5be   :  { %1875 = vmatpush3.msra.mxu0 %v1010_v5 }
 0x646   :  { %v1191_v51 = vpop.xlane.xlu1 %1190 }
 0x647   :  { %v1195_v52 = vsub.f32 %v1187_v44, %v1191_v51  ;;  %v1738_v51 = vld [vmem:[#allocation5 + $0x3] ss:$0 sm:$0xff] }
 0x649   :  { %v1197_v53 = vmul.f32 1.442695, %v1195_v52 }
 0x64a   :  { %v1194_v2 = vpop.xlane.xlu1 %1193 }
 0x64b   :  { %v1196_v38 = vsub.f32 %v1188_v49, %v1194_v2 }
 0x64d   :  { %v1199_v54 = vmul.f32 1.442695, %v1196_v38 }
 0x64f   :  { %2093 = vpow2.f32 %v1199_v54 }
 0x650   :  { %2095 = vpow2.f32 %v1197_v53 }
 0x659   :  { %v2094_v56 = vpop.eup %2093 }
 0x65a   :  { %v1204_v57 = vsel %vm321_vm10, %v2094_v56, 0.0  ;;  %v2096_v58 = vpop.eup %2095 }
 0x65b   :  { %1205 = vadd.xlane.f32.xlu1 %v1204_v57  ;;  %v1201_v59 = vsel %vm321_vm10, %v2096_v58, 0.0 }
 0x65f   :  { %1202 = vadd.xlane.f32.xlu1 %v1201_v59 }
 0x670   :  { %2061 = vrot.lane.b32.xlu1 %v2338_v41, %s2219_s15 }
 0x690   :  { %v1873_v60 = vpop.f32.mrb[6].mxu0 }
 0x691   :  { %v1001_v61 = vpop.f32.mrb[7].mxu0 }
 0x692   :  { %1876 = vmatprep.mubr.msk.f32.mxu0 %vm233_vm1, %v1001_v61 }
 0x693   :  { %1877 = vmatmul.mubr.msk.f32.vlgmr.msra.gmra.mrb[4].mxu0 %vm233_vm1, %v1873_v60 }
 0x6e8   :  { %v1206_v62 = vpop.xlane.xlu1 %1205 }
 0x6e9   :  { %2097 = vrcp.f32 %v1206_v62 }
 0x6ec   :  { %v1203_v63 = vpop.xlane.xlu1 %1202 }
 0x6ed   :  { %2099 = vrcp.f32 %v1203_v63  ;;  %v1567_v63 = vld [vmem:[%s2584_s7] sm:$0xff] }
 0x6f0   :  { %v2062_v3 = vpop.permute.xlu1 %2061 }
 0x6f1   :  { %v2064_v4 = vunpack.i.h.bf16 %v2062_v3  ;;  %v2063_v6 = vunpack.i.l.bf16 %v2062_v3  ;;  %v1568_v3 = vld [vmem:[%s2584_s7 + $0x8] sm:$0xff] }
 0x6f3   :  { %v1972_v7 = vpack.c.bf16 %v2064_v4, %v2063_v6  ;;  %v2098_v41 = vpop.eup %2097  ;;  %v1984_v4 = vpack.c.bf16 %v1568_v3, %v1567_v63  ;;  %v1569_v6 = vld [vmem:[%s2584_s7 + $0x10] sm:$0xff] }
 0x6f4   :  { %v1210_v14 = vmul.f32 %v2098_v41, %v2094_v56 }
 0x6f5   :  { %1973 = vmatprep.subr.bf16.mxu0 %v1972_v7 }
 0x6f6   :  { %1975 = vmatpush3.bf16.msra.mxu0 %v1972_v7  ;;  %v1570_v7 = vld [vmem:[%s2584_s7 + $0x18] sm:$0xff] }
 0x6f7   :  { %v2100_v10 = vpop.eup %2099  ;;  %1893 = vmatprep.subr.mxu0 %v1300_v8  ;;  %v1988_v41 = vpack.c.bf16 %v1570_v7, %v1569_v6 }
 0x6f8   :  { %v1208_v12 = vmul.f32 %v2100_v10, %v2096_v58 }
 0x6fa   :  { %1890 = vmatprep.mubr.msk.f32.mxu0 %vm321_vm10, %v1208_v12 }
 0x6fb   :  { %1891 = vmatmul.mubr.msk.f32.vlgmr.msra.gmra.mrb[8].mxu0 %vm321_vm10, %v1210_v14 }
 0x6fc   :  { %1894 = vmatpush3.msra.mxu0 %v1300_v8 }
 0x6fd   :  { %1985 = vmatprep.subr.bf16.mxu0 %v1984_v4 }
 0x7ce   :  { %v1892_v15 = vpop.f32.mrb[8].mxu0 }
 0x7cf   :  { %v1291_v16 = vpop.f32.mrb[9].mxu0 }
 0x7d0   :  { %1895 = vmatprep.mubr.msk.f32.mxu0 %vm233_vm1, %v1291_v16 }
 0x7d1   :  { %1896 = vmatmul.mubr.msk.f32.vlgmr.msra.gmra.mrb[4].mxu0 %vm233_vm1, %v1892_v15 }
 0x7d2   :  { %1987 = vmatpush3.bf16.msra.mxu0 %v1984_v4 }
 0x7d3   :  { %1989 = vmatprep.subr.bf16.mxu0 %v1988_v41 }
 0x7d6   :  { %1991 = vmatpush3.bf16.msra.mxu0 %v1988_v41 }
 0x8a4   :  { %v1897_v18 = vpop.f32.mrb[4].mxu0 }
 0x8a5   :  { %v1412_v19 = vadd.f32 %v1897_v18, %v2303_v1  ;;  %v1373_v20 = vpop.f32.mrb[5].mxu0 }
 0x8a6   :  { %v1411_v21 = vadd.f32 %v1373_v20, %v2301_v0  ;;  %v1574_v20 = vld [vmem:[%s2584_s7 + $0x38] sm:$0xff] }
 0x8a7   :  { %v2471_v22 = vadd.f32 %v1736_v17, %v1412_v19  ;;  %v1573_v19 = vld [vmem:[%s2584_s7 + $0x30] sm:$0xff] }
 0x8a8   :  { %v2473_v23 = vadd.f32 %v1736_v17, %v1411_v21  ;;  %v1996_v21 = vpack.c.bf16 %v1574_v20, %v1573_v19 }
 0x8a9   :  { %v1422_v48 = vsel %vm67_vm0, %v2471_v22, 0.0 }
 0x8aa   :  { %1423 = vadd.xlane.f32.xlu1 %v1422_v48  ;;  %v1419_v24 = vsel %vm67_vm0, %v2473_v23, 0.0  ;;  %v1739_v48 = vld [vmem:[%s2583_s6] ss:$0 sm:$0xff]  ;;  %s2222_s6 = smov [#allocation8]  }
 0x8ab   :  { %1420 = vadd.xlane.f32.xlu0 %v1419_v24 }
 0x8bb   :  { %922 = vrot.lane.b32.xlu1 %v920_v50, %s2211_s3 }
 0x8bf   :  { %345 = vrot.lane.b32.xlu1 %v2412_v9, %s2211_s3  ;;  %v1457_v9 = vld [vmem:[%s2582_s5] sm:$0xff] }
 0x8c0   :  { %v1976_v34 = vpack.c.bf16 %v1458_v33, %v1457_v9 }
 0x8c2   :  { %1977 = vmatprep.subr.bf16.mxu1 %v1976_v34 }
 0x8c3   :  { %1979 = vmatpush3.bf16.msra.mxu1 %v1976_v34 }
 0x937   :  { %v1424_v1 = vpop.xlane.xlu1 %1423 }
 0x938   :  { %v1426_v25 = vmul.f32 0.03125, %v1424_v1  ;;  %v1421_v0 = vpop.xlane.xlu0 %1420 }
 0x939   :  { %v1425_v26 = vmul.f32 0.03125, %v1421_v0 }
 0x93a   :  { %v1428_v27 = vsub.f32 %v2471_v22, %v1426_v25 }
 0x93b   :  { %v1427_v28 = vsub.f32 %v2473_v23, %v1425_v26  ;;  %v923_v49 = vpop.permute.xlu1 %922 }
 0x93c   :  { %v1430_v31 = vmul.f32 %v1428_v27, %v1428_v27 }
 0x93d   :  { %v1429_v29 = vmul.f32 %v1427_v28, %v1427_v28 }
 0x93e   :  { %v1434_v32 = vsel %vm67_vm0, %v1430_v31, 0.0 }
 0x93f   :  { %v1431_v30 = vsel %vm67_vm0, %v1429_v29, 0.0  ;;  %v346_v62 = vpop.permute.xlu1 %345 }
 0x940   :  { %1432 = vadd.xlane.f32.xlu0 %v1431_v30 }
 0x944   :  { %1435 = vadd.xlane.f32.xlu0 %v1434_v32 }
 0x95a   :  { %553 = vrot.lane.b32.xlu0 %v2423_v13, %s2211_s3  ;;  %v1460_v13 = vld [vmem:[%s2582_s5 + $0x18] sm:$0xff] }
 0x95b   :  { %v1980_v36 = vpack.c.bf16 %v1460_v13, %v1459_v35 }
 0x95d   :  { %1981 = vmatprep.subr.bf16.mxu1 %v1980_v36 }
 0x95e   :  { %1212 = vrot.lane.b32.xlu0 %v1210_v14, %s2211_s3  ;;  %1983 = vmatpush3.bf16.msra.mxu1 %v1980_v36  ;;  %s2221_s3 = smov 24   ;;  %v1572_v14 = vld [vmem:[%s2584_s7 + $0x28] sm:$0xff] }
 0x962   :  { %1384 = vrot.lane.b32.xlu0 %v2414_v11, %s2207_s20 }
 0x966   :  { %1390 = vrot.lane.b32.xlu0 %v2445_v47, %s2220_s26 }
 0x96a   :  { %1396 = vrot.lane.b32.xlu0 %v1208_v12, %s2221_s3  ;;  %v1571_v12 = vld [vmem:[%s2584_s7 + $0x20] sm:$0xff]  ;;  %s1682_s7 = sshll.u32 %s2222_s6, 4  ;;  %s1683_s7 = int_to_ptr.vmem [resolvable:$true] %s1682_s7 }
 0x96b   :  { %v1992_v17 = vpack.c.bf16 %v1572_v14, %v1571_v12  ;;  %s2153_s2 = scalar_lea.vmem %s1683_s7, 256  ;;  %p2158_p3 = scmp.lt.s32.totalorder %s1683_s7, %s1683_s7 }
 0x96c   :  { %p2154_p2 = scmp.ne.s32.totalorder %s1683_s7, %s2153_s2  ;;  %p2159_p4 = scmp.lt.s32.totalorder %s2153_s2, %s2153_s2 }
 0x96d   :  { %1993 = vmatprep.subr.bf16.mxu0 %v1992_v17 }
 0x96e   :  { %1995 = vmatpush3.bf16.msra.mxu0 %v1992_v17  ;;  %p2160_p5 = por %p2159_p4, %p2158_p3 }
 0x96f   :  { %1997 = vmatprep.subr.bf16.mxu0 %v1996_v21 }
 0x970   :  { %p2161_p6 = pnand %p2160_p5, %p2154_p2 }
 0x972   :  { %1999 = vmatpush3.bf16.msra.mxu0 %v1996_v21 }
 0x9cd   :  { %v1433_v37 = vpop.xlane.xlu0 %1432 }
 0x9ce   :  { %v1437_v39 = vmul.f32 0.03125, %v1433_v37 }
 0x9d0   :  { %v1439_v42 = vadd.f32 1e-05, %v1437_v39 }
 0x9d1   :  { %v1436_v43 = vpop.xlane.xlu0 %1435 }
 0x9d2   :  { %2101 = vrsqrt.f32 %v1439_v42  ;;  %v1438_v44 = vmul.f32 0.03125, %v1436_v43 }
 0x9d4   :  { %v1440_v45 = vadd.f32 1e-05, %v1438_v44 }
 0x9d5   :  { %v554_v46 = vpop.permute.xlu0 %553 }
 0x9d6   :  { %2103 = vrsqrt.f32 %v1440_v45  ;;  %1386 = vrot.lane.b32.xlu1 %v554_v46, %s2207_s20 }
 0x9d9   :  { %v1213_v11 = vpop.permute.xlu0 %1212 }
 0x9da   :  { %1392 = vrot.lane.b32.xlu1 %v923_v49, %s2220_s26 }
 0x9dc   :  { %v2102_v50 = vpop.eup %2101 }
 0x9dd   :  { %v1385_v5 = vpop.permute.xlu0 %1384  ;;  %v1443_v47 = vmul.f32 %v2102_v50, %v1427_v28 }
 0x9de   :  { %1398 = vrot.lane.b32.xlu1 %v1213_v11, %s2221_s3  ;;  %v1402_v57 = vsel %vm233_vm1, %v2408_v55, %v1385_v5 }
 0x9df   :  { %v1449_v52 = vmul.f32 %v1737_v40, %v1443_v47 }
 0x9e0   :  { %v2104_v2 = vpop.eup %2103 }
 0x9e1   :  { %v1444_v38 = vmul.f32 %v2104_v2, %v1428_v27  ;;  %v1391_v53 = vpop.permute.xlu0 %1390  ;;  %v1455_v54 = vadd.f32 %v1738_v51, %v1449_v52 }
 0x9e2   :  { %v1404_v58 = vsel %vm321_vm10, %v1402_v57, %v1391_v53 }
 0x9e3   :  { %v1450_v56 = vmul.f32 %v1737_v40, %v1444_v38  ;;  %1906 = vmatprep.mubr.msk.f32.mxu1 %vm67_vm0, %v1455_v54 }
 0x9e5   :  { %v1456_v59 = vadd.f32 %v1738_v51, %v1450_v56  ;;  %v1397_v60 = vpop.permute.xlu0 %1396 }
 0x9e6   :  { %v1407_v61 = vsel %vm1406_vm12, %v1404_v58, %v1397_v60 }
 0x9e7   :  { %1409 = vst.msk [vmem:[#allocation8] sm:$0xff] %vm67_vm0, %v1407_v61  ;;  %1907 = vmatmul.mubr.msk.f32.vlgmr.msra.gmra.mrb[10].mxu1 %vm67_vm0, %v1456_v59 }
 0xa48   :  { %v1387_v55 = vpop.permute.xlu1 %1386 }
 0xa49   :  { %v1403_v10 = vsel %vm233_vm1, %v346_v62, %v1387_v55 }
 0xa4c   :  { %v1393_v8 = vpop.permute.xlu1 %1392 }
 0xa4d   :  { %v1405_v15 = vsel %vm321_vm10, %v1403_v10, %v1393_v8 }
 0xa50   :  { %v1399_v16 = vpop.permute.xlu1 %1398 }
 0xa51   :  { %v1408_v18 = vsel %vm1406_vm12, %v1405_v15, %v1399_v16 }
 0xa52   :  { %1410 = vst.msk [vmem:[#allocation8 + $0x8] sm:$0xff] %vm67_vm0, %v1408_v18 }
 0xaba   :  { %v1908_v24 = vpop.f32.mrb[10].mxu1 }
 0xabb   :  { %v1546_v1 = vadd.f32 %v1908_v24, %v1739_v48  ;;  %v1540_v25 = vpop.f32.mrb[11].mxu1 }
 0xabc   :  { %v1541_v0 = vadd.f32 %v1739_v48, %v1540_v25 }
 0xabd   :  { %v1550_v26 = vmul.f32 %v1546_v1, %v1546_v1 }
 0xabe   :  { %v1549_v27 = vmul.f32 %v1541_v0, %v1541_v0 }
 0xabf   :  { %v1552_v28 = vmul.f32 %v1550_v26, %v1546_v1 }
 0xac0   :  { %v1551_v29 = vmul.f32 %v1549_v27, %v1541_v0 }
 0xac1   :  { %v1554_v30 = vmul.f32 0.044715, %v1552_v28 }
 0xac2   :  { %v1553_v31 = vmul.f32 0.044715, %v1551_v29 }
 0xac3   :  { %v1556_v32 = vadd.f32 %v1554_v30, %v1546_v1 }
 0xac4   :  { %v1555_v9 = vadd.f32 %v1553_v31, %v1541_v0 }
 0xac5   :  { %v1558_v33 = vmul.f32 0.7978846, %v1556_v32 }
 0xac6   :  { %v1557_v34 = vmul.f32 0.7978846, %v1555_v9 }
 0xac7   :  { %2105 = vtanh.f32 %v1558_v33 }
 0xac8   :  { %2107 = vtanh.f32 %v1557_v34 }
 0xad1   :  { %v2106_v35 = vpop.eup %2105 }
 0xad2   :  { %v2108_v13 = vpop.eup %2107  ;;  %v1562_v36 = vadd.f32 1.0, %v2106_v35 }
 0xad3   :  { %v1561_v37 = vadd.f32 1.0, %v2108_v13 }
 0xad4   :  { %v1564_v39 = vmul.f32 0.5, %v1562_v36 }
 0xad5   :  { %v1563_v42 = vmul.f32 0.5, %v1561_v37 }
 0xad6   :  { %v1566_v44 = vmul.f32 %v1564_v39, %v1546_v1 }
 0xad7   :  { %v1565_v43 = vmul.f32 %v1563_v42, %v1541_v0 }
 0xad9   :  { %1925 = vmatprep.mubr.msk.f32.mxu0 %vm1579_vm13, %v1565_v43 }
 0xada   :  { %1926 = vmatmul.mubr.msk.f32.vlgmr.msra.gmra.mrb[10].mxu0 %vm1579_vm13, %v1566_v44 }
 0xadb   :  { %2164 = shalt.err (!%p2161_p6)
}
 0xadc   :  { %s2165_s24 = scalar_lea.hbm %s2586_s9, 256 }
 0xadd   :  { %p2166_p7 = scmp.ne.s32.totalorder %s2586_s9, %s2165_s24  ;;  %p2169_p8 = scmp.lt.u32.totalorder %s2165_s24, %s2586_s9 }
 0xadf   :  { %p2171_p9 = pnand %p2169_p8, %p2166_p7 }
 0xae1   :  { %2174 = shalt.err (!%p2171_p9)
}
 0xae2   :  { %1688 = dma.vmem_to_hbm [thread:$0]  %s1683_s7, 256, %s2586_s9, [#allocation9], %s2206_s19, %s2206_s19, %s2207_s20   ;;  %v1742_v45 = vld [vmem:[#allocation5 + $0x5] ss:$0 sm:$0xff] }
 0xae3   :  { %s2223_s29 = smov [#allocation7]  }
 0xae4   :  { %s1670_s30 = sshll.u32 %s2223_s29, 4  ;;  %s1671_s30 = int_to_ptr.vmem [resolvable:$true] %s1670_s30 }
 0xae5   :  { %s2175_s11 = scalar_lea.vmem %s1671_s30, 256  ;;  %p2180_p11 = scmp.lt.s32.totalorder %s1671_s30, %s1671_s30 }
 0xae6   :  { %p2176_p10 = scmp.ne.s32.totalorder %s1671_s30, %s2175_s11  ;;  %p2181_p12 = scmp.lt.s32.totalorder %s2175_s11, %s2175_s11 }
 0xae8   :  { %p2182_p13 = por %p2181_p12, %p2180_p11 }
 0xaea   :  { %p2183_p0 = pnand %p2182_p13, %p2176_p10 }
 0xbad   :  { %v1927_v46 = vpop.f32.mrb[10].mxu0 }
 0xbae   :  { %v1658_v49 = vadd.f32 %v1927_v46, %v1742_v45  ;;  %v1652_v11 = vpop.f32.mrb[11].mxu0 }
 0xbaf   :  { %v1653_v50 = vadd.f32 %v1742_v45, %v1652_v11 }
 0xbb0   :  { %v1662_v40 = vadd.f32 %v1658_v49, %v2471_v22 }
 0xbb1   :  { %v1661_v5 = vadd.f32 %v1653_v50, %v2473_v23 }
 0xbb2   :  { %1664 = vst.msk [vmem:[#allocation7 + $0x8] sm:$0xff] %vm67_vm0, %v1662_v40 }
 0xbb3   :  { %1663 = vst.msk [vmem:[#allocation7] sm:$0xff] %vm67_vm0, %v1661_v5 }
 0xbb4   :  { %2186 = shalt.err (!%p2183_p0)
}
 0xbb5   :  { %s2187_s0 = scalar_lea.hbm %s2585_s8, 256 }
 0xbb6   :  { %p2188_p1 = scmp.ne.s32.totalorder %s2585_s8, %s2187_s0  ;;  %p2191_p2 = scmp.lt.u32.totalorder %s2187_s0, %s2585_s8 }
 0xbb8   :  { %p2193_p3 = pnand %p2191_p2, %p2188_p1 }
 0xbba   :  { %2196 = shalt.err (!%p2193_p3)
}
 0xbbb   :  { %1676 = dma.vmem_to_hbm [thread:$0]  %s1671_s30, 256, %s2585_s8, [#allocation4], %s2206_s19, %s2206_s19, %s2207_s20  }
 0xbbc   :  { %2201 = dma.done.wait [#allocation4], 256  }
 0xbbd   :  { %2202 = vsyncadd [#allocation4], 4294967040 }
 0xbbe   :  { %2203 = dma.done.wait [#allocation9], 256  }
 0xbbf   :  { %2204 = vsyncadd [#allocation9], 4294967040 }
 0xbc0   :  { %1695 = vsyncpa [#allocation3], 1 }
 0xbc1   :  { %1696 = vsyncpa [#allocation6], 1 }
 0xbc2   :  { %1697 = vsyncpa [#allocation4], 1 }
 0xbc3   :  { %1698 = vsyncpa [#allocation9], 1 }

</bundles_post_ra>
